<compile_context>
chip_gen: v7x
topology: tpu7x:2x2x1
jax: 0.10.0
libtpu: 0.0.40
codegen_flags: <defaults>
</compile_context>

<pallas_src>
import functools
import math

import jax
import jax.numpy as jnp
from jax.experimental import pallas as pl
from jax.experimental.pallas import tpu as pltpu

EPS = 1e-5
MOMENTUM = 0.1

_VMEM_LIMIT = 48 * 1024 * 1024          # safe headroom on v7x (64 MiB physical)
_TILE_BUDGET_BYTES = 2 * 1024 * 1024    # target bytes per (f32) input tile


# ----------------------------- kernels ------------------------------------ #

def _col_stats_kernel(x_ref, sum_ref, sq_ref, *, rows_total):
    """Accumulate per-lane (per packed-channel) sum / sumsq over row tiles."""
    i = pl.program_id(0)

    @pl.when(i == 0)
    def _init():
        sum_ref[...] = jnp.zeros_like(sum_ref)
        sq_ref[...] = jnp.zeros_like(sq_ref)

    x = x_ref[...].astype(jnp.float32)
    tile_rows = x.shape[0]
    if rows_total % tile_rows:                      # mask the partial last tile
        row = i * tile_rows + jax.lax.broadcasted_iota(jnp.int32, x.shape, 0)
        x = jnp.where(row < rows_total, x, 0.0)

    sum_ref[...] += jnp.sum(x, axis=0, keepdims=True)
    sq_ref[...] += jnp.sum(x * x, axis=0, keepdims=True)


def _row_stats_kernel(x_ref, sum_ref, sq_ref):
    """Per-row sum / sumsq; rows are (n, c) pairs of the NCHW tensor."""
    x = x_ref[...].astype(jnp.float32)              # (tr, H*W)
    sum_ref[...] = jnp.sum(x, axis=1, keepdims=True)
    sq_ref[...] = jnp.sum(x * x, axis=1, keepdims=True)


def _affine_kernel(x_ref, scale_ref, shift_ref, y_ref):
    """y = x * scale + shift (scale/shift broadcast over rows or lanes)."""
    y = x_ref[...].astype(jnp.float32) * scale_ref[...] + shift_ref[...]
    y_ref[...] = y.astype(y_ref.dtype)


# --------------------------- pallas_call wrappers -------------------------- #

def _pick_tile_rows(total_rows, row_bytes):
    if total_rows <= 8:
        return total_rows                            # single block == full dim
    tr = (_TILE_BUDGET_BYTES // max(row_bytes, 1)) // 8 * 8
    tr = max(tr, 8)
    tr = min(tr, total_rows // 8 * 8)
    return tr


def _stats_cols(x_packed):
    rows, cp = x_packed.shape
    tr = _pick_tile_rows(rows, cp * 4)
    grid = (pl.cdiv(rows, tr),)
    kernel = functools.partial(_col_stats_kernel, rows_total=rows)
    return pl.pallas_call(
        kernel,
        out_shape=(jax.ShapeDtypeStruct((1, cp), jnp.float32),
                   jax.ShapeDtypeStruct((1, cp), jnp.float32)),
        grid=grid,
        in_specs=[pl.BlockSpec((tr, cp), lambda i: (i, 0))],
        out_specs=(pl.BlockSpec((1, cp), lambda i: (0, 0)),
                   pl.BlockSpec((1, cp), lambda i: (0, 0))),
        compiler_params=pltpu.CompilerParams(
            dimension_semantics=("arbitrary",),
            vmem_limit_bytes=_VMEM_LIMIT),
        cost_estimate=pl.CostEstimate(flops=3 * rows * cp, transcendentals=0,
                                      bytes_accessed=rows * cp * 4 + 8 * cp),
    )(x_packed)


def _stats_rows(x_rows):
    rows, lanes = x_rows.shape
    tr = _pick_tile_rows(rows, lanes * 4)
    grid = (pl.cdiv(rows, tr),)
    return pl.pallas_call(
        _row_stats_kernel,
        out_shape=(jax.ShapeDtypeStruct((rows, 1), jnp.float32),
                   jax.ShapeDtypeStruct((rows, 1), jnp.float32)),
        grid=grid,
        in_specs=[pl.BlockSpec((tr, lanes), lambda i: (i, 0))],
        out_specs=(pl.BlockSpec((tr, 1), lambda i: (i, 0)),
                   pl.BlockSpec((tr, 1), lambda i: (i, 0))),
        compiler_params=pltpu.CompilerParams(
            dimension_semantics=("parallel",),
            vmem_limit_bytes=_VMEM_LIMIT),
        cost_estimate=pl.CostEstimate(flops=3 * rows * lanes, transcendentals=0,
                                      bytes_accessed=rows * lanes * 4 + 8 * rows),
    )(x_rows)


def _affine_cols(x_packed, scale_p, shift_p):
    rows, cp = x_packed.shape
    tr = _pick_tile_rows(rows, cp * 4)
    grid = (pl.cdiv(rows, tr),)
    esize = x_packed.dtype.itemsize
    return pl.pallas_call(
        _affine_kernel,
        out_shape=jax.ShapeDtypeStruct((rows, cp), x_packed.dtype),
        grid=grid,
        in_specs=[pl.BlockSpec((tr, cp), lambda i: (i, 0)),
                  pl.BlockSpec((1, cp), lambda i: (0, 0)),
                  pl.BlockSpec((1, cp), lambda i: (0, 0))],
        out_specs=pl.BlockSpec((tr, cp), lambda i: (i, 0)),
        compiler_params=pltpu.CompilerParams(
            dimension_semantics=("parallel",),
            vmem_limit_bytes=_VMEM_LIMIT),
        cost_estimate=pl.CostEstimate(flops=2 * rows * cp, transcendentals=0,
                                      bytes_accessed=2 * rows * cp * esize),
    )(x_packed, scale_p, shift_p)


def _affine_rows(x_rows, scale_r, shift_r):
    rows, lanes = x_rows.shape
    tr = _pick_tile_rows(rows, lanes * 4)
    grid = (pl.cdiv(rows, tr),)
    esize = x_rows.dtype.itemsize
    return pl.pallas_call(
        _affine_kernel,
        out_shape=jax.ShapeDtypeStruct((rows, lanes), x_rows.dtype),
        grid=grid,
        in_specs=[pl.BlockSpec((tr, lanes), lambda i: (i, 0)),
                  pl.BlockSpec((tr, 1), lambda i: (i, 0)),
                  pl.BlockSpec((tr, 1), lambda i: (i, 0))],
        out_specs=pl.BlockSpec((tr, lanes), lambda i: (i, 0)),
        compiler_params=pltpu.CompilerParams(
            dimension_semantics=("parallel",),
            vmem_limit_bytes=_VMEM_LIMIT),
        cost_estimate=pl.CostEstimate(flops=2 * rows * lanes, transcendentals=0,
                                      bytes_accessed=2 * rows * lanes * esize),
    )(x_rows, scale_r, shift_r)


# ------------------------------ batch norm --------------------------------- #

@functools.partial(jax.jit, static_argnames=("training",))
def _batch_norm_2d(X, gamma, beta, moving_mean, moving_var, training=True):
    """X: (N, C); gamma/beta/moving_*: (C,). Returns (Y, new_mm, new_mv)."""
    M, C = X.shape
    # Lane packing: fold k row-groups into the lane axis so vregs / stores are
    # dense when C < 128 (e.g. C=32 -> k=4 -> 128 dense lanes).
    k = math.gcd(max(1, 128 // C), M) if C < 128 else 1
    cp = k * C
    x_packed = X.reshape(M // k, cp)                 # free, row-major view

    if training:
        psum, psq = _stats_cols(x_packed)            # (1, cp) each
        ch_sum = jnp.sum(psum.reshape(k, C), axis=0)
        ch_sq = jnp.sum(psq.reshape(k, C), axis=0)
        mean = ch_sum / M
        var = jnp.maximum(ch_sq / M - mean * mean, 0.0)
        new_mm = (1.0 - MOMENTUM) * moving_mean + MOMENTUM * mean
        new_mv = (1.0 - MOMENTUM) * moving_var + MOMENTUM * var
    else:
        mean, var = moving_mean, moving_var
        new_mm, new_mv = moving_mean, moving_var

    scale = gamma * jax.lax.rsqrt(var + EPS)         # (C,)
    shift = beta - mean * scale
    scale_p = jnp.tile(scale.reshape(1, C), (1, k))  # (1, cp)
    shift_p = jnp.tile(shift.reshape(1, C), (1, k))

    y_packed = _affine_cols(x_packed, scale_p, shift_p)
    return y_packed.reshape(M, C), new_mm, new_mv


@functools.partial(jax.jit, static_argnames=("training",))
def _batch_norm_4d(X, gamma, beta, moving_mean, moving_var, training=True):
    """X: (N, C, H, W) NCHW; gamma/beta/moving_*: (C,). No layout transposes."""
    N, C, H, W = X.shape
    L = H * W
    x_rows = X.reshape(N * C, L)                     # free, native-layout view

    if training:
        row_sum, row_sq = _stats_rows(x_rows)        # (N*C, 1) each
        ch_sum = jnp.sum(row_sum.reshape(N, C), axis=0)
        ch_sq = jnp.sum(row_sq.reshape(N, C), axis=0)
        count = N * L
        mean = ch_sum / count
        var = jnp.maximum(ch_sq / count - mean * mean, 0.0)
        new_mm = (1.0 - MOMENTUM) * moving_mean + MOMENTUM * mean
        new_mv = (1.0 - MOMENTUM) * moving_var + MOMENTUM * var
    else:
        mean, var = moving_mean, moving_var
        new_mm, new_mv = moving_mean, moving_var

    scale = gamma * jax.lax.rsqrt(var + EPS)         # (C,)
    shift = beta - mean * scale
    # Per-(n, c) row scale/shift so the affine pass streams X in native layout.
    scale_r = jnp.broadcast_to(scale[None, :], (N, C)).reshape(N * C, 1)
    shift_r = jnp.broadcast_to(shift[None, :], (N, C)).reshape(N * C, 1)

    y_rows = _affine_rows(x_rows, scale_r, shift_r)
    return y_rows.reshape(N, C, H, W), new_mm, new_mv


class BatchNorm:
    """JAX/Pallas equivalent of the PyTorch BatchNorm module."""

    def __init__(self, num_features, num_dims):
        assert num_dims in (2, 4)
        shape = (1, num_features) if num_dims == 2 else (1, num_features, 1, 1)
        self.num_features = num_features
        self.num_dims = num_dims
        self.training = True                          # torch.is_grad_enabled() analogue
        self.gamma = jnp.ones(shape, jnp.float32)
        self.beta = jnp.zeros(shape, jnp.float32)
        self.moving_mean = jnp.zeros(shape, jnp.float32)
        self.moving_var = jnp.ones(shape, jnp.float32)

    def __call__(self, X):
        C = self.num_features
        gamma = self.gamma.reshape(C).astype(jnp.float32)
        beta = self.beta.reshape(C).astype(jnp.float32)
        mm = self.moving_mean.reshape(C).astype(jnp.float32)
        mv = self.moving_var.reshape(C).astype(jnp.float32)

        if self.num_dims == 2:
            Y, new_mm, new_mv = _batch_norm_2d(X, gamma, beta, mm, mv,
                                               training=self.training)
            shape = (1, C)
        else:
            Y, new_mm, new_mv = _batch_norm_4d(X, gamma, beta, mm, mv,
                                               training=self.training)
            shape = (1, C, 1, 1)

        self.moving_mean = new_mm.reshape(shape)
        self.moving_var = new_mv.reshape(shape)
        return Y


# ------------------------------ references --------------------------------- #

def _reference_4d(X, gamma, beta, mm, mv):
    mean = jnp.mean(X, axis=(0, 2, 3), keepdims=True)
    var = jnp.mean((X - mean) ** 2, axis=(0, 2, 3), keepdims=True)
    Y = gamma * (X - mean) / jnp.sqrt(var + EPS) + beta
    return Y, (1 - MOMENTUM) * mm + MOMENTUM * mean, (1 - MOMENTUM) * mv + MOMENTUM * var


def _reference_2d(X, gamma, beta, mm, mv):
    mean = jnp.mean(X, axis=0, keepdims=True)
    var = jnp.mean((X - mean) ** 2, axis=0, keepdims=True)
    Y = gamma * (X - mean) / jnp.sqrt(var + EPS) + beta
    return Y, (1 - MOMENTUM) * mm + MOMENTUM * mean, (1 - MOMENTUM) * mv + MOMENTUM * var


if __name__ == "__main__":
    key = jax.random.PRNGKey(0)
    k4, k2 = jax.random.split(key)

    # --- 4D (conv-style) case: NCHW, batch=2, channels=4, spatial=16 ---
    X4 = jax.random.normal(k4, (2, 4, 16, 16), jnp.float32) * 2.0 + 0.5
    bn4 = BatchNorm(num_features=4, num_dims=4)
    Y4 = bn4(X4)
    jax.block_until_ready(Y4)
    Y4_ref, mm4_ref, mv4_ref = _reference_4d(
        X4, bn4.gamma, bn4.beta, jnp.zeros((1, 4, 1, 1)), jnp.ones((1, 4, 1, 1)))
    assert jnp.allclose(Y4, Y4_ref, atol=1e-4, rtol=1e-4)
    assert jnp.allclose(bn4.moving_mean, mm4_ref, atol=1e-5)
    assert jnp.allclose(bn4.moving_var, mv4_ref, atol=1e-5)

    # --- 2D (fully-connected) case: batch=8, features=32 ---
    X2 = jax.random.normal(k2, (8, 32), jnp.float32)
    bn2 = BatchNorm(num_features=32, num_dims=2)
    Y2 = bn2(X2)
    jax.block_until_ready(Y2)
    Y2_ref, mm2_ref, mv2_ref = _reference_2d(
        X2, bn2.gamma, bn2.beta, jnp.zeros((1, 32)), jnp.ones((1, 32)))
    assert jnp.allclose(Y2, Y2_ref, atol=1e-4, rtol=1e-4)
    assert jnp.allclose(bn2.moving_mean, mm2_ref, atol=1e-5)
    assert jnp.allclose(bn2.moving_var, mv2_ref, atol=1e-5)

    # --- inference path (uses moving stats) ---
    bn4.training = False
    Y4e = bn4(X4)
    jax.block_until_ready(Y4e)
    Y4e_ref = bn4.gamma * (X4 - bn4.moving_mean) / jnp.sqrt(bn4.moving_var + EPS) + bn4.beta
    assert jnp.allclose(Y4e, Y4e_ref, atol=1e-4, rtol=1e-4)

    print("KERNEL_OK")
</pallas_src>

<mosaic_0001>
module attributes {stable_mosaic.version = 11 : i64} {
  func.func @_row_stats_kernel(%arg0: i32, %arg1: memref<8x256xf32, #tpu.memory_space<vmem>>, %arg2: memref<8x1xf32, #tpu.memory_space<vmem>>, %arg3: memref<8x1xf32, #tpu.memory_space<vmem>>) attributes {dimension_semantics = [#tpu.dimension_semantics<parallel>], iteration_bounds = array<i64: 1>, scalar_prefetch = 0 : i64, scratch_operands = 0 : i64, tpu.core_type = #tpu.core_type<tc>, window_params = [{transform_indices = @transform_0, window_bounds = array<i64: 8, 256>}, {transform_indices = @transform_1, window_bounds = array<i64: 8, 1>}, {transform_indices = @transform_2, window_bounds = array<i64: 8, 1>}]} {
    %c0 = arith.constant 0 : index
    %c0_0 = arith.constant 0 : index
    %0 = vector.load %arg1[%c0, %c0_0] : memref<8x256xf32, #tpu.memory_space<vmem>>, vector<8x256xf32>
    %cst = arith.constant dense<0.000000e+00> : vector<8xf32>
    %1 = vector.multi_reduction <add>, %0, %cst [1] : vector<8x256xf32> to vector<8xf32>
    %2 = vector.shape_cast %1 : vector<8xf32> to vector<8x1xf32>
    %c0_1 = arith.constant 0 : index
    %c0_2 = arith.constant 0 : index
    %3 = vector.load %arg2[%c0_1, %c0_2] : memref<8x1xf32, #tpu.memory_space<vmem>>, vector<8x1xf32>
    tpu.vector_store %arg2[%c0_1, %c0_2], %2 {strides = array<i32>} : memref<8x1xf32, #tpu.memory_space<vmem>>, vector<8x1xf32>,
    %4 = arith.mulf %0, %0 : vector<8x256xf32>
    %cst_3 = arith.constant dense<0.000000e+00> : vector<8xf32>
    %5 = vector.multi_reduction <add>, %4, %cst_3 [1] : vector<8x256xf32> to vector<8xf32>
    %6 = vector.shape_cast %5 : vector<8xf32> to vector<8x1xf32>
    %c0_4 = arith.constant 0 : index
    %c0_5 = arith.constant 0 : index
    %7 = vector.load %arg3[%c0_4, %c0_5] : memref<8x1xf32, #tpu.memory_space<vmem>>, vector<8x1xf32>
    tpu.vector_store %arg3[%c0_4, %c0_5], %6 {strides = array<i32>} : memref<8x1xf32, #tpu.memory_space<vmem>>, vector<8x1xf32>,
    return
  }
  func.func @transform_0(%arg0: i32) -> (i32, i32) {
    %c0_i32 = arith.constant 0 : i32
    %c0_i32_0 = arith.constant 0 : i32
    return %arg0, %c0_i32 : i32, i32
  }
  func.func @transform_1(%arg0: i32) -> (i32, i32) {
    %c0_i32 = arith.constant 0 : i32
    %c0_i32_0 = arith.constant 0 : i32
    return %arg0, %c0_i32 : i32, i32
  }
  func.func @transform_2(%arg0: i32) -> (i32, i32) {
    %c0_i32 = arith.constant 0 : i32
    %c0_i32_0 = arith.constant 0 : i32
    return %arg0, %c0_i32 : i32, i32
  }
}

module attributes {stable_mosaic.version = 11 : i64} {
  func.func @_affine_kernel(%arg0: i32, %arg1: memref<8x256xf32, #tpu.memory_space<vmem>>, %arg2: memref<8x1xf32, #tpu.memory_space<vmem>>, %arg3: memref<8x1xf32, #tpu.memory_space<vmem>>, %arg4: memref<8x256xf32, #tpu.memory_space<vmem>>) attributes {dimension_semantics = [#tpu.dimension_semantics<parallel>], iteration_bounds = array<i64: 1>, scalar_prefetch = 0 : i64, scratch_operands = 0 : i64, tpu.core_type = #tpu.core_type<tc>, window_params = [{transform_indices = @transform_0, window_bounds = array<i64: 8, 256>}, {transform_indices = @transform_1, window_bounds = array<i64: 8, 1>}, {transform_indices = @transform_2, window_bounds = array<i64: 8, 1>}, {transform_indices = @transform_3, window_bounds = array<i64: 8, 256>}]} {
    %c0 = arith.constant 0 : index
    %c0_0 = arith.constant 0 : index
    %0 = vector.load %arg1[%c0, %c0_0] : memref<8x256xf32, #tpu.memory_space<vmem>>, vector<8x256xf32>
    %c0_1 = arith.constant 0 : index
    %c0_2 = arith.constant 0 : index
    %1 = vector.load %arg2[%c0_1, %c0_2] : memref<8x1xf32, #tpu.memory_space<vmem>>, vector<8x1xf32>
    %2 = vector.broadcast %1 : vector<8x1xf32> to vector<8x256xf32>
    %3 = arith.mulf %0, %2 : vector<8x256xf32>
    %c0_3 = arith.constant 0 : index
    %c0_4 = arith.constant 0 : index
    %4 = vector.load %arg3[%c0_3, %c0_4] : memref<8x1xf32, #tpu.memory_space<vmem>>, vector<8x1xf32>
    %5 = vector.broadcast %4 : vector<8x1xf32> to vector<8x256xf32>
    %6 = arith.addf %3, %5 : vector<8x256xf32>
    %c0_5 = arith.constant 0 : index
    %c0_6 = arith.constant 0 : index
    %7 = vector.load %arg4[%c0_5, %c0_6] : memref<8x256xf32, #tpu.memory_space<vmem>>, vector<8x256xf32>
    tpu.vector_store %arg4[%c0_5, %c0_6], %6 {strides = array<i32>} : memref<8x256xf32, #tpu.memory_space<vmem>>, vector<8x256xf32>,
    return
  }
  func.func @transform_0(%arg0: i32) -> (i32, i32) {
    %c0_i32 = arith.constant 0 : i32
    %c0_i32_0 = arith.constant 0 : i32
    return %arg0, %c0_i32 : i32, i32
  }
  func.func @transform_1(%arg0: i32) -> (i32, i32) {
    %c0_i32 = arith.constant 0 : i32
    %c0_i32_0 = arith.constant 0 : i32
    return %arg0, %c0_i32 : i32, i32
  }
  func.func @transform_2(%arg0: i32) -> (i32, i32) {
    %c0_i32 = arith.constant 0 : i32
    %c0_i32_0 = arith.constant 0 : i32
    return %arg0, %c0_i32 : i32, i32
  }
  func.func @transform_3(%arg0: i32) -> (i32, i32) {
    %c0_i32 = arith.constant 0 : i32
    %c0_i32_0 = arith.constant 0 : i32
    return %arg0, %c0_i32 : i32, i32
  }
}

</mosaic_0001>

<bundles_post_ra>
// kernel: _batch_norm_4d.2
= control target key start
LH: loop header
LB: loop body
LE: loop exit
PB: predicated region body
PF: predicated region fallthrough
CT: control target
= control target key end

     0   :  { %vm15_vm0 = vcmask 7168   ;;  %s58_s0 = inlined_call_operand.vmem [shape: f32[8,256], index: 0, kind: input, shape index: {}]   ;;  %s59_s1 = inlined_call_operand.vmem [shape: f32[8,1], index: 1, kind: output, shape index: {0}]   ;;  %s60_s2 = inlined_call_operand.vmem [shape: f32[8,1], index: 2, kind: output, shape index: {1}]  }
   0x1   :  { %v10_v0 = vld [vmem:[%s58_s0] sm:$0xff]  ;;  %v11_v1 = vld [vmem:[%s58_s0 + $0x8] sm:$0xff] }
   0x2   :  { %v12_v2 = vadd.f32 %v11_v1, %v10_v0  ;;  %v17_v3 = vmul.f32 %v10_v0, %v10_v0  ;;  %v18_v4 = vmul.f32 %v11_v1, %v11_v1 }
   0x4   :  { %13 = vadd.xlane.f32.xlu0 %v12_v2  ;;  %v19_v5 = vadd.f32 %v18_v4, %v17_v3 }
   0x8   :  { %20 = vadd.xlane.f32.xlu0 %v19_v5 }
  0x91   :  { %v14_v6 = vpop.xlane.xlu0 %13 }
  0x92   :  { %16 = vst.msk [vmem:[%s59_s1] sm:$0xff] %vm15_vm0, %v14_v6 }
  0x95   :  { %v21_v7 = vpop.xlane.xlu0 %20 }
  0x96   :  { %22 = vst.msk [vmem:[%s60_s2] sm:$0xff] %vm15_vm0, %v21_v7 }

// kernel: _batch_norm_4d.3
= control target key start
LH: loop header
LB: loop body
LE: loop exit
PB: predicated region body
PF: predicated region fallthrough
CT: control target
= control target key end

     0   :  { %v40_v0 = vmov 0   ;;  %s79_s1 = inlined_call_operand.vmem [shape: f32[8,1], index: 1, kind: input, shape index: {}]   ;;  %s80_s2 = inlined_call_operand.vmem [shape: f32[8,1], index: 2, kind: input, shape index: {}]   ;;  %s81_s0 = inlined_call_operand.vmem [shape: f32[8,256], index: 0, kind: input, shape index: {}]   ;;  %s82_s3 = inlined_call_operand.vmem [shape: f32[8,256], index: 3, kind: output, shape index: {}]  }
   0x1   :  { %39 = vset.pattern.permute.xlu0 %v40_v0  ;;  %v16_v1 = vld [vmem:[%s79_s1] sm:$0xff]  ;;  %v15_v5 = vld [vmem:[%s81_s0 + $0x8] sm:$0xff] }
   0x2   :  { %19 = vperm.xlu0 %39, %v16_v1   ;;  %v24_v2 = vld [vmem:[%s80_s2] sm:$0xff] }
   0x3   :  { %v14_v4 = vld [vmem:[%s81_s0] sm:$0xff] }
   0x6   :  { %27 = vperm.xlu0 %39, %v24_v2  }
  0x81   :  { %v20_v3 = vpop.permute.xlu0 %19 }
  0x82   :  { %v22_v6 = vmul.f32 %v20_v3, %v14_v4  ;;  %v23_v7 = vmul.f32 %v20_v3, %v15_v5 }
  0x85   :  { %v28_v8 = vpop.permute.xlu0 %27 }
  0x86   :  { %v30_v9 = vadd.f32 %v28_v8, %v22_v6  ;;  %v31_v10 = vadd.f32 %v28_v8, %v23_v7 }
  0x88   :  { %32 = vst [vmem:[%s82_s3] sm:$0xff] %v30_v9  ;;  %33 = vst [vmem:[%s82_s3 + $0x8] sm:$0xff] %v31_v10 }

</bundles_post_ra>
